<compile_context>
chip_gen: v6e
topology: v6e:2x2x1
jax: 0.10.0
libtpu: 0.0.40
codegen_flags: <defaults>
</compile_context>

<pallas_src>
import jax
import jax.numpy as jnp
from jax.experimental import pallas as pl
from jax.experimental.pallas import tpu as pltpu

_BN_EPS = 1e-5
# MXU feed dtype for activations / weights (accumulation is always f32).
# Set to jnp.float32 for a slow, bit-accurate debug path.
_CDT = jnp.bfloat16

_VMEM_LIMIT_CACHE = None


def _vmem_limit_bytes():
    """Generation-aware scoped-VMEM budget (~3/4 of physical VMEM)."""
    global _VMEM_LIMIT_CACHE
    if _VMEM_LIMIT_CACHE is None:
        cap = 128 * 1024 * 1024
        try:
            cap = int(getattr(pltpu.get_tpu_info(), "vmem_capacity_bytes", cap))
        except Exception:
            pass
        _VMEM_LIMIT_CACHE = (cap // 4) * 3
    return _VMEM_LIMIT_CACHE


def _fold_bn(conv_bias, gamma, beta, mean, var, eps=_BN_EPS):
    """(scale, bias) so that BN(conv(x) + conv_bias) == scale*conv(x) + bias."""
    s = gamma / jnp.sqrt(var + eps)
    return s, (conv_bias - mean) * s + beta


def _layout(H, W):
    """Padded-flat plane layout: row-major (H+2)x(W+2) plane on the lane axis,
    with front slack so the interior (output row 0, col 0) starts at an
    aligned lane offset, and total length padded to a multiple of 128."""
    Wp = W + 2
    L = H * Wp                                       # flat extent of H output rows
    interior = ((Wp + 1 + 127) // 128) * 128         # aligned interior start
    front = interior - (Wp + 1)                      # front slack lanes
    end = max(front + (H + 2) * Wp + 2, interior + L)
    Lp = ((end + 127) // 128) * 128
    return Wp, L, front, interior, Lp


def _pad_flat(x_nchw, H, W):
    """(N,C,H,W) f32/bf16 -> (N,C,Lp) bf16 padded-flat plane."""
    N, C, _, _ = x_nchw.shape
    Wp, L, front, interior, Lp = _layout(H, W)
    xp = jnp.pad(x_nchw.astype(_CDT), ((0, 0), (0, 0), (1, 1), (1, 1)))
    xf = xp.reshape(N, C, (H + 2) * Wp)
    return jnp.pad(xf, ((0, 0), (0, 0), (front, Lp - front - (H + 2) * Wp)))


# --------------------------------------------------------------------------- #
# Stage 1: ConvTranspose2d(k=2, s=2, p=0) + BN + ReLU   (single dot)
# --------------------------------------------------------------------------- #
def _convt_kernel(x_ref, w_ref, b_ref, o_ref):
    # x:(Cin, N*S) bf16   w:(4*Cout, Cin) bf16 (BN scale folded)   b:(4*Cout,1)
    acc = jnp.dot(w_ref[...], x_ref[...], preferred_element_type=jnp.float32)
    o_ref[...] = jnp.maximum(acc + b_ref[...], 0.0).astype(o_ref.dtype)


def convt2x2_s2_bn_relu(x2_nchw, wT, bT, bn):
    """(N, Cin, H2, W2) -> (N, Cout, 2*H2, 2*W2) bf16."""
    N, Cin, H2, W2 = x2_nchw.shape
    Cout = wT.shape[1]
    S = H2 * W2

    # Batch on the lane axis -> lane-dense (Cin, N*S) operand, one grid step.
    x = jnp.transpose(x2_nchw.reshape(N, Cin, S), (1, 0, 2)).reshape(Cin, N * S)
    x = x.astype(_CDT)

    scale, bias = _fold_bn(bT, *bn)
    # 4 taps stacked along M: w4[(a*2+b)*Cout + co, ci] = scale[co]*wT[ci,co,a,b]
    w4 = jnp.transpose(wT, (2, 3, 1, 0)) * scale[None, None, :, None]
    w4 = w4.reshape(4 * Cout, Cin).astype(_CDT)
    b4 = jnp.tile(bias, 4).reshape(4 * Cout, 1).astype(jnp.float32)

    flops = 2 * 4 * Cout * Cin * N * S
    bytes_accessed = int(x.size * 2 + w4.size * 2 + b4.size * 4
                         + 4 * Cout * N * S * 2)

    out = pl.pallas_call(
        _convt_kernel,
        out_shape=jax.ShapeDtypeStruct((4 * Cout, N * S), _CDT),
        grid=(1,),
        in_specs=[
            pl.BlockSpec((Cin, N * S), lambda i: (0, 0)),
            pl.BlockSpec((4 * Cout, Cin), lambda i: (0, 0)),
            pl.BlockSpec((4 * Cout, 1), lambda i: (0, 0)),
        ],
        out_specs=pl.BlockSpec((4 * Cout, N * S), lambda i: (0, 0)),
        compiler_params=pltpu.CompilerParams(
            dimension_semantics=("arbitrary",),
            vmem_limit_bytes=_vmem_limit_bytes()),
        cost_estimate=pl.CostEstimate(flops=flops, transcendentals=0,
                                      bytes_accessed=bytes_accessed),
    )(x, w4, b4)

    # TODO(synk): 2x2 interleave (strided lane scatter) stays as XLA glue.
    out = out.reshape(2, 2, Cout, N, H2, W2)
    out = jnp.transpose(out, (3, 2, 4, 0, 5, 1)).reshape(N, Cout, 2 * H2, 2 * W2)
    return out


# --------------------------------------------------------------------------- #
# Stages 2/3: Conv2d(3x3, pad=1) + BN + ReLU, K-stacked taps
# --------------------------------------------------------------------------- #
def _make_conv3x3_kernel(n_src, H, W, padded_out):
    Wp, L, front, interior, Lp = _layout(H, W)
    Lw = L + 2 * Wp

    def kernel(*refs):
        x_refs = refs[:n_src]                       # each (1, C_s, Lp) bf16
        if padded_out:
            w_ref, b_ref, mask_ref, o_ref = refs[n_src:]
        else:
            w_ref, b_ref, o_ref = refs[n_src:]

        # Build the 3 dj-shifted copies of every source ONCE (stacked along K)
        # and reuse them across the 3 di rows below.
        parts = []
        for s in range(n_src):
            for dj in range(3):
                parts.append(x_refs[s][0, :, front + dj:front + dj + Lw])
        stack = jnp.concatenate(parts, axis=0)      # (3*C_total, Lw) bf16

        acc = None
        for di in range(3):                         # 3 dots, K = 3*C_total
            d = jnp.dot(w_ref[di], stack[:, di * Wp:di * Wp + L],
                        preferred_element_type=jnp.float32)
            acc = d if acc is None else acc + d

        y = jnp.maximum(acc + b_ref[...], 0.0)      # (Cout, L) f32

        if padded_out:
            # Junk width-padding columns must be zero: they are the next
            # conv's zero padding.
            y = y * mask_ref[...]
            cout = y.shape[0]
            # Aligned interior store + two small border-zero stores.
            o_ref[0, :, :interior] = jnp.zeros((cout, interior), o_ref.dtype)
            o_ref[0, :, interior:interior + L] = y.astype(o_ref.dtype)
            if Lp - interior - L > 0:
                o_ref[0, :, interior + L:] = jnp.zeros(
                    (cout, Lp - interior - L), o_ref.dtype)
        else:
            o_ref[0] = y.astype(o_ref.dtype)

    return kernel


def conv3x3_p1_bn_relu(xs_pf, ws, conv_bias, bn, H, W, *, padded_out, out_dtype):
    """Conv3x3(pad=1)+BN+ReLU over channel-split padded-flat inputs.

    xs_pf: list of (N, C_s, Lp) bf16 padded-flat planes (channel concat fused).
    ws:    list of (Cout, C_s, 3, 3) f32 weights matching xs_pf.
    """
    Wp, L, front, interior, Lp = _layout(H, W)
    N = xs_pf[0].shape[0]
    Cout = ws[0].shape[0]
    src_channels = tuple(x.shape[1] for x in xs_pf)
    assert all(x.shape[0] == N and x.shape[2] == Lp for x in xs_pf)
    assert all(w.shape[1] == c for w, c in zip(ws, src_channels))

    scale, bias = _fold_bn(conv_bias, *bn)
    # K-stacked weights, BN scale folded in (f32 multiply, then bf16 cast):
    # wk[di, co, (s, dj, c)] = scale[co] * ws[s][co, c, di, dj]
    wk = jnp.stack(
        [jnp.concatenate([w[:, :, di, dj] for w in ws for dj in range(3)],
                         axis=1)
         for di in range(3)], axis=0)                # (3, Cout, 3*C_total)
    wk = (wk * scale[None, :, None]).astype(_CDT)
    bias = bias.reshape(Cout, 1).astype(jnp.float32)

    c_total = sum(src_channels)
    out_len = Lp if padded_out else L
    out_bytes = jnp.dtype(out_dtype).itemsize

    in_specs = [pl.BlockSpec((1, c, Lp), lambda n: (n, 0, 0))
                for c in src_channels]
    in_specs.append(pl.BlockSpec(wk.shape, lambda n: (0, 0, 0)))
    in_specs.append(pl.BlockSpec((Cout, 1), lambda n: (0, 0)))
    operands = list(xs_pf) + [wk, bias]
    if padded_out:
        mask = (jnp.arange(L, dtype=jnp.int32) % Wp < W).astype(jnp.float32)
        mask = mask.reshape(1, L)
        in_specs.append(pl.BlockSpec((1, L), lambda n: (0, 0)))
        operands.append(mask)

    flops = 2 * N * Cout * 9 * c_total * L
    bytes_accessed = int(sum(x.size * 2 for x in xs_pf) + wk.size * 2
                         + 4 * Cout + N * Cout * out_len * out_bytes)

    # TODO(synk): at production sizes add a row-tile grid axis (1-row halo) for
    # >=2-4 steps per core / v7x VMEM, and Buffered(1) on invariant operands.
    return pl.pallas_call(
        _make_conv3x3_kernel(len(xs_pf), H, W, padded_out),
        out_shape=jax.ShapeDtypeStruct((N, Cout, out_len), out_dtype),
        grid=(N,),
        in_specs=in_specs,
        out_specs=pl.BlockSpec((1, Cout, out_len), lambda n: (n, 0, 0)),
        compiler_params=pltpu.CompilerParams(
            dimension_semantics=("parallel",),
            vmem_limit_bytes=_vmem_limit_bytes()),
        cost_estimate=pl.CostEstimate(flops=flops, transcendentals=0,
                                      bytes_accessed=bytes_accessed),
    )(*operands)


# --------------------------------------------------------------------------- #
# Full forward pass of `up`
# --------------------------------------------------------------------------- #
def up_forward(params, x1_nchw, x2_nchw):
    """Pallas implementation of up.forward(x1, x2). NCHW in / NCHW f32 out."""
    N, C1, H, W = x1_nchw.shape
    Cout = params["w2"].shape[0]
    Wp, L, front, interior, Lp = _layout(H, W)

    # Stage 1: ConvTranspose2d(2,2,s=2)+BN+ReLU, 4 taps stacked along M.
    x2u = convt2x2_s2_bn_relu(x2_nchw, params["wT"], params["bT"], params["bnT"])

    # Stage 2: Conv3x3+BN+ReLU, channel concat fused in-kernel; output emitted
    # directly in stage 3's padded-flat layout (aligned interior store).
    h1 = conv3x3_p1_bn_relu(
        [_pad_flat(x1_nchw, H, W), _pad_flat(x2u, H, W)],
        [params["w1"][:, :C1], params["w1"][:, C1:]],
        params["b1"], params["bn1"], H, W,
        padded_out=True, out_dtype=_CDT)

    # Stage 3: Conv3x3+BN+ReLU, consumes h1 with zero glue, no mask multiply.
    h2 = conv3x3_p1_bn_relu(
        [h1], [params["w2"]], params["b2"], params["bn2"], H, W,
        padded_out=False, out_dtype=jnp.float32)

    # Drop the two junk columns per row; free split-reshape + one tiny slice.
    return h2.reshape(N, Cout, H, Wp)[..., :W]


# ------------------------- pure-JAX reference (NCHW) ----------------------- #
def up_reference(params, x1, x2, eps=_BN_EPS):
    def bn_relu(y, gamma, beta, mean, var):
        s = gamma / jnp.sqrt(var + eps)
        y = y * s[None, :, None, None] + (beta - mean * s)[None, :, None, None]
        return jnp.maximum(y, 0.0)

    t = jnp.einsum("ncij,cdab->ndiajb", x2, params["wT"])
    N, Cout, H2, _, W2, _ = t.shape
    y2 = t.reshape(N, Cout, 2 * H2, 2 * W2) + params["bT"][None, :, None, None]
    y2 = bn_relu(y2, *params["bnT"])

    x = jnp.concatenate([x1, y2], axis=1)

    def conv_bn_relu(x, w, b, bn):
        y = jax.lax.conv_general_dilated(
            x, w, (1, 1), ((1, 1), (1, 1)),
            dimension_numbers=("NCHW", "OIHW", "NCHW"))
        return bn_relu(y + b[None, :, None, None], *bn)

    x = conv_bn_relu(x, params["w1"], params["b1"], params["bn1"])
    x = conv_bn_relu(x, params["w2"], params["b2"], params["bn2"])
    return x


# ---------------------------------- main ----------------------------------- #
def make_params(key, inC, outC):
    ks = jax.random.split(key, 12)

    def bn(k):
        k1, k2 = jax.random.split(k)
        gamma = jax.random.uniform(k1, (outC,), jnp.float32, 0.5, 1.5)
        beta = 0.1 * jax.random.normal(k2, (outC,), jnp.float32)
        return (gamma, beta, jnp.zeros((outC,), jnp.float32),
                jnp.ones((outC,), jnp.float32))

    return {
        # ConvTranspose2d(inC, outC, k=2, s=2): weight (inC, outC, 2, 2)
        "wT": 0.1 * jax.random.normal(ks[0], (inC, outC, 2, 2), jnp.float32),
        "bT": 0.1 * jax.random.normal(ks[1], (outC,), jnp.float32),
        "bnT": bn(ks[2]),
        # Conv2d(inC, outC, k=3, p=1): weight (outC, inC, 3, 3)
        "w1": 0.1 * jax.random.normal(ks[3], (outC, inC, 3, 3), jnp.float32),
        "b1": 0.1 * jax.random.normal(ks[4], (outC,), jnp.float32),
        "bn1": bn(ks[5]),
        # Conv2d(outC, outC, k=3, p=1)
        "w2": 0.1 * jax.random.normal(ks[6], (outC, outC, 3, 3), jnp.float32),
        "b2": 0.1 * jax.random.normal(ks[7], (outC,), jnp.float32),
        "bn2": bn(ks[8]),
    }


if __name__ == "__main__":
    inC, outC = 8, 4          # U-Net convention: x1 has inC-outC = outC channels
    N, H, W = 2, 16, 16

    key = jax.random.PRNGKey(0)
    kp, k1, k2 = jax.random.split(key, 3)
    params = make_params(kp, inC, outC)

    x1 = jax.random.normal(k1, (N, inC - outC, H, W), jnp.float32)     # (2,4,16,16)
    x2 = jax.random.normal(k2, (N, inC, H // 2, W // 2), jnp.float32)  # (2,8,8,8)

    out = jax.block_until_ready(jax.jit(up_forward)(params, x1, x2))
    ref = jax.block_until_ready(up_reference(params, x1, x2))

    assert out.shape == (N, outC, H, W), out.shape
    # bf16 MXU feeds / bf16 stage intermediates vs f32 reference -> relaxed tol.
    assert jnp.allclose(out, ref, atol=5e-2, rtol=5e-2), \
        float(jnp.max(jnp.abs(out - ref)))

    print("KERNEL_OK")
</pallas_src>

<mosaic_0001>
module attributes {stable_mosaic.version = 11 : i64} {
  func.func @_convt_kernel(%arg0: i32, %arg1: memref<8x128xbf16, #tpu.memory_space<vmem>>, %arg2: memref<16x8xbf16, #tpu.memory_space<vmem>>, %arg3: memref<16x1xf32, #tpu.memory_space<vmem>>, %arg4: memref<16x128xbf16, #tpu.memory_space<vmem>>) attributes {dimension_semantics = [#tpu.dimension_semantics<arbitrary>], iteration_bounds = array<i64: 1>, scalar_prefetch = 0 : i64, scratch_operands = 0 : i64, tpu.core_type = #tpu.core_type<tc>, window_params = [{pipeline_mode = #tpu.pipeline_mode<synchronous>, transform_indices = @transform_0, window_bounds = array<i64: 8, 128>}, {pipeline_mode = #tpu.pipeline_mode<synchronous>, transform_indices = @transform_1, window_bounds = array<i64: 16, 8>}, {pipeline_mode = #tpu.pipeline_mode<synchronous>, transform_indices = @transform_2, window_bounds = array<i64: 16, 1>}, {pipeline_mode = #tpu.pipeline_mode<synchronous>, transform_indices = @transform_3, window_bounds = array<i64: 16, 128>}]} {
    %c0 = arith.constant 0 : index
    %c0_0 = arith.constant 0 : index
    %0 = vector.load %arg2[%c0, %c0_0] : memref<16x8xbf16, #tpu.memory_space<vmem>>, vector<16x8xbf16>
    %c0_1 = arith.constant 0 : index
    %c0_2 = arith.constant 0 : index
    %1 = vector.load %arg1[%c0_1, %c0_2] : memref<8x128xbf16, #tpu.memory_space<vmem>>, vector<8x128xbf16>
    %cst = arith.constant dense<0.000000e+00> : vector<16x128xf32>
    %2 = tpu.matmul %0, %1, %cst {dimension_numbers = #tpu.dot_dimension_numbers<[1], [0], [0], [1], [0, 0, 1, 1], [], []>} : vector<16x8xbf16>, vector<8x128xbf16>, vector<16x128xf32> -> vector<16x128xf32>
    %c0_3 = arith.constant 0 : index
    %c0_4 = arith.constant 0 : index
    %3 = vector.load %arg3[%c0_3, %c0_4] : memref<16x1xf32, #tpu.memory_space<vmem>>, vector<16x1xf32>
    %4 = vector.broadcast %3 : vector<16x1xf32> to vector<16x128xf32>
    %5 = arith.addf %2, %4 : vector<16x128xf32>
    %cst_5 = arith.constant 0.000000e+00 : f32
    %6 = vector.broadcast %cst_5 : f32 to vector<16x128xf32>
    %7 = arith.maximumf %5, %6 : vector<16x128xf32>
    %8 = arith.truncf %7 : vector<16x128xf32> to vector<16x128xbf16>
    %c0_6 = arith.constant 0 : index
    %c0_7 = arith.constant 0 : index
    %9 = vector.load %arg4[%c0_6, %c0_7] : memref<16x128xbf16, #tpu.memory_space<vmem>>, vector<16x128xbf16>
    tpu.vector_store %arg4[%c0_6, %c0_7], %8 {strides = array<i32>} : memref<16x128xbf16, #tpu.memory_space<vmem>>, vector<16x128xbf16>,
    return
  }
  func.func @transform_0(%arg0: i32) -> (i32, i32) {
    %c0_i32 = arith.constant 0 : i32
    %c0_i32_0 = arith.constant 0 : i32
    %c0_i32_1 = arith.constant 0 : i32
    return %c0_i32, %c0_i32_0 : i32, i32
  }
  func.func @transform_1(%arg0: i32) -> (i32, i32) {
    %c0_i32 = arith.constant 0 : i32
    %c0_i32_0 = arith.constant 0 : i32
    %c0_i32_1 = arith.constant 0 : i32
    return %c0_i32, %c0_i32_0 : i32, i32
  }
  func.func @transform_2(%arg0: i32) -> (i32, i32) {
    %c0_i32 = arith.constant 0 : i32
    %c0_i32_0 = arith.constant 0 : i32
    %c0_i32_1 = arith.constant 0 : i32
    return %c0_i32, %c0_i32_0 : i32, i32
  }
  func.func @transform_3(%arg0: i32) -> (i32, i32) {
    %c0_i32 = arith.constant 0 : i32
    %c0_i32_0 = arith.constant 0 : i32
    %c0_i32_1 = arith.constant 0 : i32
    return %c0_i32, %c0_i32_0 : i32, i32
  }
}

module attributes {stable_mosaic.version = 11 : i64} {
  func.func @kernel(%arg0: i32, %arg1: memref<1x4x512xbf16, #tpu.memory_space<vmem>>, %arg2: memref<1x4x512xbf16, #tpu.memory_space<vmem>>, %arg3: memref<3x4x24xbf16, #tpu.memory_space<vmem>>, %arg4: memref<4x1xf32, #tpu.memory_space<vmem>>, %arg5: memref<1x288xf32, #tpu.memory_space<vmem>>, %arg6: memref<1x4x512xbf16, #tpu.memory_space<vmem>>) attributes {dimension_semantics = [#tpu.dimension_semantics<parallel>], iteration_bounds = array<i64: 2>, scalar_prefetch = 0 : i64, scratch_operands = 0 : i64, tpu.core_type = #tpu.core_type<tc>, window_params = [{transform_indices = @transform_0, window_bounds = array<i64: 1, 4, 512>}, {transform_indices = @transform_1, window_bounds = array<i64: 1, 4, 512>}, {pipeline_mode = #tpu.pipeline_mode<synchronous>, transform_indices = @transform_2, window_bounds = array<i64: 3, 4, 24>}, {pipeline_mode = #tpu.pipeline_mode<synchronous>, transform_indices = @transform_3, window_bounds = array<i64: 4, 1>}, {pipeline_mode = #tpu.pipeline_mode<synchronous>, transform_indices = @transform_4, window_bounds = array<i64: 1, 288>}, {transform_indices = @transform_5, window_bounds = array<i64: 1, 4, 512>}]} {
    %c0 = arith.constant 0 : index
    %c0_0 = arith.constant 0 : index
    %c109 = arith.constant 109 : index
    %0 = vector.load %arg1[%c0, %c0_0, %c109] : memref<1x4x512xbf16, #tpu.memory_space<vmem>>, vector<1x4x324xbf16>
    %1 = vector.shape_cast %0 : vector<1x4x324xbf16> to vector<4x324xbf16>
    %c0_1 = arith.constant 0 : index
    %c0_2 = arith.constant 0 : index
    %c110 = arith.constant 110 : index
    %2 = vector.load %arg1[%c0_1, %c0_2, %c110] : memref<1x4x512xbf16, #tpu.memory_space<vmem>>, vector<1x4x324xbf16>
    %3 = vector.shape_cast %2 : vector<1x4x324xbf16> to vector<4x324xbf16>
    %c0_3 = arith.constant 0 : index
    %c0_4 = arith.constant 0 : index
    %c111 = arith.constant 111 : index
    %4 = vector.load %arg1[%c0_3, %c0_4, %c111] : memref<1x4x512xbf16, #tpu.memory_space<vmem>>, vector<1x4x324xbf16>
    %5 = vector.shape_cast %4 : vector<1x4x324xbf16> to vector<4x324xbf16>
    %c0_5 = arith.constant 0 : index
    %c0_6 = arith.constant 0 : index
    %c109_7 = arith.constant 109 : index
    %6 = vector.load %arg2[%c0_5, %c0_6, %c109_7] : memref<1x4x512xbf16, #tpu.memory_space<vmem>>, vector<1x4x324xbf16>
    %7 = vector.shape_cast %6 : vector<1x4x324xbf16> to vector<4x324xbf16>
    %c0_8 = arith.constant 0 : index
    %c0_9 = arith.constant 0 : index
    %c110_10 = arith.constant 110 : index
    %8 = vector.load %arg2[%c0_8, %c0_9, %c110_10] : memref<1x4x512xbf16, #tpu.memory_space<vmem>>, vector<1x4x324xbf16>
    %9 = vector.shape_cast %8 : vector<1x4x324xbf16> to vector<4x324xbf16>
    %c0_11 = arith.constant 0 : index
    %c0_12 = arith.constant 0 : index
    %c111_13 = arith.constant 111 : index
    %10 = vector.load %arg2[%c0_11, %c0_12, %c111_13] : memref<1x4x512xbf16, #tpu.memory_space<vmem>>, vector<1x4x324xbf16>
    %11 = vector.shape_cast %10 : vector<1x4x324xbf16> to vector<4x324xbf16>
    %12 = tpu.concatenate %1, %3, %5, %7, %9, %11 in 0 : vector<4x324xbf16>, vector<4x324xbf16>, vector<4x324xbf16>, vector<4x324xbf16>, vector<4x324xbf16>, vector<4x324xbf16> -> vector<24x324xbf16>
    %c0_14 = arith.constant 0 : index
    %c0_15 = arith.constant 0 : index
    %c0_16 = arith.constant 0 : index
    %13 = vector.load %arg3[%c0_14, %c0_15, %c0_16] : memref<3x4x24xbf16, #tpu.memory_space<vmem>>, vector<1x4x24xbf16>
    %14 = vector.shape_cast %13 : vector<1x4x24xbf16> to vector<4x24xbf16>
    %15 = vector.extract_strided_slice %12 {offsets = [0, 0], sizes = [24, 288], strides = [1, 1]} : vector<24x324xbf16> to vector<24x288xbf16>
    %cst = arith.constant dense<0.000000e+00> : vector<4x288xf32>
    %16 = tpu.matmul %14, %15, %cst {dimension_numbers = #tpu.dot_dimension_numbers<[1], [0], [0], [1], [0, 0, 1, 1], [], []>} : vector<4x24xbf16>, vector<24x288xbf16>, vector<4x288xf32> -> vector<4x288xf32>
    %c1 = arith.constant 1 : index
    %c0_17 = arith.constant 0 : index
    %c0_18 = arith.constant 0 : index
    %17 = vector.load %arg3[%c1, %c0_17, %c0_18] : memref<3x4x24xbf16, #tpu.memory_space<vmem>>, vector<1x4x24xbf16>
    %18 = vector.shape_cast %17 : vector<1x4x24xbf16> to vector<4x24xbf16>
    %19 = vector.extract_strided_slice %12 {offsets = [0, 18], sizes = [24, 288], strides = [1, 1]} : vector<24x324xbf16> to vector<24x288xbf16>
    %cst_19 = arith.constant dense<0.000000e+00> : vector<4x288xf32>
    %20 = tpu.matmul %18, %19, %cst_19 {dimension_numbers = #tpu.dot_dimension_numbers<[1], [0], [0], [1], [0, 0, 1, 1], [], []>} : vector<4x24xbf16>, vector<24x288xbf16>, vector<4x288xf32> -> vector<4x288xf32>
    %21 = arith.addf %16, %20 : vector<4x288xf32>
    %c2 = arith.constant 2 : index
    %c0_20 = arith.constant 0 : index
    %c0_21 = arith.constant 0 : index
    %22 = vector.load %arg3[%c2, %c0_20, %c0_21] : memref<3x4x24xbf16, #tpu.memory_space<vmem>>, vector<1x4x24xbf16>
    %23 = vector.shape_cast %22 : vector<1x4x24xbf16> to vector<4x24xbf16>
    %24 = vector.extract_strided_slice %12 {offsets = [0, 36], sizes = [24, 288], strides = [1, 1]} : vector<24x324xbf16> to vector<24x288xbf16>
    %cst_22 = arith.constant dense<0.000000e+00> : vector<4x288xf32>
    %25 = tpu.matmul %23, %24, %cst_22 {dimension_numbers = #tpu.dot_dimension_numbers<[1], [0], [0], [1], [0, 0, 1, 1], [], []>} : vector<4x24xbf16>, vector<24x288xbf16>, vector<4x288xf32> -> vector<4x288xf32>
    %26 = arith.addf %21, %25 : vector<4x288xf32>
    %c0_23 = arith.constant 0 : index
    %c0_24 = arith.constant 0 : index
    %27 = vector.load %arg4[%c0_23, %c0_24] : memref<4x1xf32, #tpu.memory_space<vmem>>, vector<4x1xf32>
    %28 = vector.broadcast %27 : vector<4x1xf32> to vector<4x288xf32>
    %29 = arith.addf %26, %28 : vector<4x288xf32>
    %cst_25 = arith.constant 0.000000e+00 : f32
    %30 = vector.broadcast %cst_25 : f32 to vector<4x288xf32>
    %31 = arith.maximumf %29, %30 : vector<4x288xf32>
    %c0_26 = arith.constant 0 : index
    %c0_27 = arith.constant 0 : index
    %32 = vector.load %arg5[%c0_26, %c0_27] : memref<1x288xf32, #tpu.memory_space<vmem>>, vector<1x288xf32>
    %33 = vector.broadcast %32 : vector<1x288xf32> to vector<4x288xf32>
    %34 = arith.mulf %31, %33 : vector<4x288xf32>
    %cst_28 = arith.constant 0.000000e+00 : bf16
    %35 = vector.broadcast %cst_28 : bf16 to vector<4x128xbf16>
    %c0_29 = arith.constant 0 : index
    %c0_30 = arith.constant 0 : index
    %c0_31 = arith.constant 0 : index
    %36 = vector.load %arg6[%c0_29, %c0_30, %c0_31] : memref<1x4x512xbf16, #tpu.memory_space<vmem>>, vector<1x4x128xbf16>
    %37 = vector.shape_cast %36 : vector<1x4x128xbf16> to vector<4x128xbf16>
    %38 = vector.shape_cast %35 : vector<4x128xbf16> to vector<1x4x128xbf16>
    tpu.vector_store %arg6[%c0_29, %c0_30, %c0_31], %38 {strides = array<i32>} : memref<1x4x512xbf16, #tpu.memory_space<vmem>>, vector<1x4x128xbf16>,
    %39 = arith.truncf %34 : vector<4x288xf32> to vector<4x288xbf16>
    %c0_32 = arith.constant 0 : index
    %c0_33 = arith.constant 0 : index
    %c128 = arith.constant 128 : index
    %40 = vector.load %arg6[%c0_32, %c0_33, %c128] : memref<1x4x512xbf16, #tpu.memory_space<vmem>>, vector<1x4x288xbf16>
    %41 = vector.shape_cast %40 : vector<1x4x288xbf16> to vector<4x288xbf16>
    %42 = vector.shape_cast %39 : vector<4x288xbf16> to vector<1x4x288xbf16>
    tpu.vector_store %arg6[%c0_32, %c0_33, %c128], %42 {strides = array<i32>} : memref<1x4x512xbf16, #tpu.memory_space<vmem>>, vector<1x4x288xbf16>,
    %cst_34 = arith.constant 0.000000e+00 : bf16
    %43 = vector.broadcast %cst_34 : bf16 to vector<4x96xbf16>
    %c0_35 = arith.constant 0 : index
    %c0_36 = arith.constant 0 : index
    %c416 = arith.constant 416 : index
    %44 = vector.load %arg6[%c0_35, %c0_36, %c416] : memref<1x4x512xbf16, #tpu.memory_space<vmem>>, vector<1x4x96xbf16>
    %45 = vector.shape_cast %44 : vector<1x4x96xbf16> to vector<4x96xbf16>
    %46 = vector.shape_cast %43 : vector<4x96xbf16> to vector<1x4x96xbf16>
    tpu.vector_store %arg6[%c0_35, %c0_36, %c416], %46 {strides = array<i32>} : memref<1x4x512xbf16, #tpu.memory_space<vmem>>, vector<1x4x96xbf16>,
    return
  }
  func.func @transform_0(%arg0: i32) -> (i32, i32, i32) {
    %c0_i32 = arith.constant 0 : i32
    %c0_i32_0 = arith.constant 0 : i32
    %c0_i32_1 = arith.constant 0 : i32
    return %arg0, %c0_i32, %c0_i32_0 : i32, i32, i32
  }
  func.func @transform_1(%arg0: i32) -> (i32, i32, i32) {
    %c0_i32 = arith.constant 0 : i32
    %c0_i32_0 = arith.constant 0 : i32
    %c0_i32_1 = arith.constant 0 : i32
    return %arg0, %c0_i32, %c0_i32_0 : i32, i32, i32
  }
  func.func @transform_2(%arg0: i32) -> (i32, i32, i32) {
    %c0_i32 = arith.constant 0 : i32
    %c0_i32_0 = arith.constant 0 : i32
    %c0_i32_1 = arith.constant 0 : i32
    %c0_i32_2 = arith.constant 0 : i32
    return %c0_i32, %c0_i32_0, %c0_i32_1 : i32, i32, i32
  }
  func.func @transform_3(%arg0: i32) -> (i32, i32) {
    %c0_i32 = arith.constant 0 : i32
    %c0_i32_0 = arith.constant 0 : i32
    %c0_i32_1 = arith.constant 0 : i32
    return %c0_i32, %c0_i32_0 : i32, i32
  }
  func.func @transform_4(%arg0: i32) -> (i32, i32) {
    %c0_i32 = arith.constant 0 : i32
    %c0_i32_0 = arith.constant 0 : i32
    %c0_i32_1 = arith.constant 0 : i32
    return %c0_i32, %c0_i32_0 : i32, i32
  }
  func.func @transform_5(%arg0: i32) -> (i32, i32, i32) {
    %c0_i32 = arith.constant 0 : i32
    %c0_i32_0 = arith.constant 0 : i32
    %c0_i32_1 = arith.constant 0 : i32
    return %arg0, %c0_i32, %c0_i32_0 : i32, i32, i32
  }
}

module attributes {stable_mosaic.version = 11 : i64} {
  func.func @kernel(%arg0: i32, %arg1: memref<1x4x512xbf16, #tpu.memory_space<vmem>>, %arg2: memref<3x4x12xbf16, #tpu.memory_space<vmem>>, %arg3: memref<4x1xf32, #tpu.memory_space<vmem>>, %arg4: memref<1x4x288xf32, #tpu.memory_space<vmem>>) attributes {dimension_semantics = [#tpu.dimension_semantics<parallel>], iteration_bounds = array<i64: 2>, scalar_prefetch = 0 : i64, scratch_operands = 0 : i64, tpu.core_type = #tpu.core_type<tc>, window_params = [{transform_indices = @transform_0, window_bounds = array<i64: 1, 4, 512>}, {pipeline_mode = #tpu.pipeline_mode<synchronous>, transform_indices = @transform_1, window_bounds = array<i64: 3, 4, 12>}, {pipeline_mode = #tpu.pipeline_mode<synchronous>, transform_indices = @transform_2, window_bounds = array<i64: 4, 1>}, {transform_indices = @transform_3, window_bounds = array<i64: 1, 4, 288>}]} {
    %c0 = arith.constant 0 : index
    %c0_0 = arith.constant 0 : index
    %c109 = arith.constant 109 : index
    %0 = vector.load %arg1[%c0, %c0_0, %c109] : memref<1x4x512xbf16, #tpu.memory_space<vmem>>, vector<1x4x324xbf16>
    %1 = vector.shape_cast %0 : vector<1x4x324xbf16> to vector<4x324xbf16>
    %c0_1 = arith.constant 0 : index
    %c0_2 = arith.constant 0 : index
    %c110 = arith.constant 110 : index
    %2 = vector.load %arg1[%c0_1, %c0_2, %c110] : memref<1x4x512xbf16, #tpu.memory_space<vmem>>, vector<1x4x324xbf16>
    %3 = vector.shape_cast %2 : vector<1x4x324xbf16> to vector<4x324xbf16>
    %c0_3 = arith.constant 0 : index
    %c0_4 = arith.constant 0 : index
    %c111 = arith.constant 111 : index
    %4 = vector.load %arg1[%c0_3, %c0_4, %c111] : memref<1x4x512xbf16, #tpu.memory_space<vmem>>, vector<1x4x324xbf16>
    %5 = vector.shape_cast %4 : vector<1x4x324xbf16> to vector<4x324xbf16>
    %6 = tpu.concatenate %1, %3, %5 in 0 : vector<4x324xbf16>, vector<4x324xbf16>, vector<4x324xbf16> -> vector<12x324xbf16>
    %c0_5 = arith.constant 0 : index
    %c0_6 = arith.constant 0 : index
    %c0_7 = arith.constant 0 : index
    %7 = vector.load %arg2[%c0_5, %c0_6, %c0_7] : memref<3x4x12xbf16, #tpu.memory_space<vmem>>, vector<1x4x12xbf16>
    %8 = vector.shape_cast %7 : vector<1x4x12xbf16> to vector<4x12xbf16>
    %9 = vector.extract_strided_slice %6 {offsets = [0, 0], sizes = [12, 288], strides = [1, 1]} : vector<12x324xbf16> to vector<12x288xbf16>
    %cst = arith.constant dense<0.000000e+00> : vector<4x288xf32>
    %10 = tpu.matmul %8, %9, %cst {dimension_numbers = #tpu.dot_dimension_numbers<[1], [0], [0], [1], [0, 0, 1, 1], [], []>} : vector<4x12xbf16>, vector<12x288xbf16>, vector<4x288xf32> -> vector<4x288xf32>
    %c1 = arith.constant 1 : index
    %c0_8 = arith.constant 0 : index
    %c0_9 = arith.constant 0 : index
    %11 = vector.load %arg2[%c1, %c0_8, %c0_9] : memref<3x4x12xbf16, #tpu.memory_space<vmem>>, vector<1x4x12xbf16>
    %12 = vector.shape_cast %11 : vector<1x4x12xbf16> to vector<4x12xbf16>
    %13 = vector.extract_strided_slice %6 {offsets = [0, 18], sizes = [12, 288], strides = [1, 1]} : vector<12x324xbf16> to vector<12x288xbf16>
    %cst_10 = arith.constant dense<0.000000e+00> : vector<4x288xf32>
    %14 = tpu.matmul %12, %13, %cst_10 {dimension_numbers = #tpu.dot_dimension_numbers<[1], [0], [0], [1], [0, 0, 1, 1], [], []>} : vector<4x12xbf16>, vector<12x288xbf16>, vector<4x288xf32> -> vector<4x288xf32>
    %15 = arith.addf %10, %14 : vector<4x288xf32>
    %c2 = arith.constant 2 : index
    %c0_11 = arith.constant 0 : index
    %c0_12 = arith.constant 0 : index
    %16 = vector.load %arg2[%c2, %c0_11, %c0_12] : memref<3x4x12xbf16, #tpu.memory_space<vmem>>, vector<1x4x12xbf16>
    %17 = vector.shape_cast %16 : vector<1x4x12xbf16> to vector<4x12xbf16>
    %18 = vector.extract_strided_slice %6 {offsets = [0, 36], sizes = [12, 288], strides = [1, 1]} : vector<12x324xbf16> to vector<12x288xbf16>
    %cst_13 = arith.constant dense<0.000000e+00> : vector<4x288xf32>
    %19 = tpu.matmul %17, %18, %cst_13 {dimension_numbers = #tpu.dot_dimension_numbers<[1], [0], [0], [1], [0, 0, 1, 1], [], []>} : vector<4x12xbf16>, vector<12x288xbf16>, vector<4x288xf32> -> vector<4x288xf32>
    %20 = arith.addf %15, %19 : vector<4x288xf32>
    %c0_14 = arith.constant 0 : index
    %c0_15 = arith.constant 0 : index
    %21 = vector.load %arg3[%c0_14, %c0_15] : memref<4x1xf32, #tpu.memory_space<vmem>>, vector<4x1xf32>
    %22 = vector.broadcast %21 : vector<4x1xf32> to vector<4x288xf32>
    %23 = arith.addf %20, %22 : vector<4x288xf32>
    %cst_16 = arith.constant 0.000000e+00 : f32
    %24 = vector.broadcast %cst_16 : f32 to vector<4x288xf32>
    %25 = arith.maximumf %23, %24 : vector<4x288xf32>
    %c0_17 = arith.constant 0 : index
    %c0_18 = arith.constant 0 : index
    %c0_19 = arith.constant 0 : index
    %26 = vector.load %arg4[%c0_17, %c0_18, %c0_19] : memref<1x4x288xf32, #tpu.memory_space<vmem>>, vector<1x4x288xf32>
    %27 = vector.shape_cast %26 : vector<1x4x288xf32> to vector<4x288xf32>
    %28 = vector.shape_cast %25 : vector<4x288xf32> to vector<1x4x288xf32>
    tpu.vector_store %arg4[%c0_17, %c0_18, %c0_19], %28 {strides = array<i32>} : memref<1x4x288xf32, #tpu.memory_space<vmem>>, vector<1x4x288xf32>,
    return
  }
  func.func @transform_0(%arg0: i32) -> (i32, i32, i32) {
    %c0_i32 = arith.constant 0 : i32
    %c0_i32_0 = arith.constant 0 : i32
    %c0_i32_1 = arith.constant 0 : i32
    return %arg0, %c0_i32, %c0_i32_0 : i32, i32, i32
  }
  func.func @transform_1(%arg0: i32) -> (i32, i32, i32) {
    %c0_i32 = arith.constant 0 : i32
    %c0_i32_0 = arith.constant 0 : i32
    %c0_i32_1 = arith.constant 0 : i32
    %c0_i32_2 = arith.constant 0 : i32
    return %c0_i32, %c0_i32_0, %c0_i32_1 : i32, i32, i32
  }
  func.func @transform_2(%arg0: i32) -> (i32, i32) {
    %c0_i32 = arith.constant 0 : i32
    %c0_i32_0 = arith.constant 0 : i32
    %c0_i32_1 = arith.constant 0 : i32
    return %c0_i32, %c0_i32_0 : i32, i32
  }
  func.func @transform_3(%arg0: i32) -> (i32, i32, i32) {
    %c0_i32 = arith.constant 0 : i32
    %c0_i32_0 = arith.constant 0 : i32
    %c0_i32_1 = arith.constant 0 : i32
    return %arg0, %c0_i32, %c0_i32_0 : i32, i32, i32
  }
}

</mosaic_0001>

<bundles_post_ra>
// kernel: tile.8
= control target key start
LH: loop header
LB: loop body
LE: loop exit
PB: predicated region body
PF: predicated region fallthrough
CT: control target
= control target key end

     0   :  { %s22_s0 = inlined_call_operand.vmem [shape: f32[4], index: 0, kind: input, shape index: {}]   ;;  %s23_s1 = inlined_call_operand.vmem [shape: f32[4,4], index: 1, kind: output, shape index: {}]  }
   0x1   :  { %v4_v0 = vld [vmem:[%s22_s0] ss:$0 sm:$0xff] }
   0x2   :  { %5 = vst [vmem:[%s23_s1] sm:$0xf] %v4_v0 }

// kernel: tile.0
= control target key start
LH: loop header
LB: loop body
LE: loop exit
PB: predicated region body
PF: predicated region fallthrough
CT: control target
= control target key end

     0   :  { %s35_s8 = smov 125   ;;  %vm8_vm0 = vcmask 7168   ;;  %s36_s11 = smov 126   ;;  %s62_s0 = inlined_call_operand.vmem [shape: f32[4,4], index: 0, kind: input, shape index: {}]   ;;  %s63_s1 = inlined_call_operand.vmem [shape: f32[16,1], index: 1, kind: output, shape index: {}]  }
   0x1   :  { %v5_v0 = vld [vmem:[%s62_s0] sm:$0xf]  ;;  %s34_s0 = smov 127  }
   0x2   :  { %6 = vst [vmem:[#allocation0] sm:$0xf] %v5_v0 }
   0x9   :  { %v10_v1 = vld [vmem:[#allocation0] sm:$0xf]  }
   0xa   :  { %v22_v2 = vld [vmem:[#allocation0] sm:$0xf]   ;;  %11 = vrot.lane.b32.xlu0 %v10_v1, %s34_s0 }
   0xb   :  { %23 = vrot.lane.b32.xlu1 %v22_v2, %s35_s8  ;;  %v7_v3 = vld [vmem:[#allocation0] sm:$0xf]  }
   0xc   :  { %v16_v4 = vld [vmem:[#allocation0] sm:$0xf]   ;;  %9 = vst.msk [vmem:[%s63_s1] ss:$4 sm:$0xf] %vm8_vm0, %v7_v3  }
   0xe   :  { %17 = vrot.lane.b32.xlu0 %v16_v4, %s36_s11 }
  0x7c   :  { %v12_v5 = vpop.permute.xlu0 %11  }
  0x7d   :  { %v24_v6 = vpop.permute.xlu1 %23   ;;  %28 = vst.msk [vmem:[%s63_s1 + $0x1] ss:$4 sm:$0xf] %vm8_vm0, %v12_v5  }
  0x7e   :  { %30 = vst.msk [vmem:[%s63_s1 + $0x3] ss:$4 sm:$0xf] %vm8_vm0, %v24_v6  }
  0x80   :  { %v18_v7 = vpop.permute.xlu0 %17  }
  0x81   :  { %29 = vst.msk [vmem:[%s63_s1 + $0x2] ss:$4 sm:$0xf] %vm8_vm0, %v18_v7  }

// kernel: up_forward.3
= control target key start
LH: loop header
LB: loop body
LE: loop exit
PB: predicated region body
PF: predicated region fallthrough
CT: control target
= control target key end

     0   :  { %vm39_vm0 = vcmask 1043456   ;;  %v124_v0 = vmov 0.0   ;;  %vm125_vm1 = vmmov 0   ;;  %vm35_vm2 = vcmask 64512   ;;  %s162_s0 = inlined_call_operand.vmem [shape: bf16[8,128], index: 0, kind: input, shape index: {}]   ;;  %s163_s1 = inlined_call_operand.vmem [shape: bf16[16,8], index: 1, kind: input, shape index: {}]   ;;  %s164_s2 = inlined_call_operand.vmem [shape: f32[16,1], index: 2, kind: input, shape index: {}]   ;;  %s165_s3 = inlined_call_operand.vmem [shape: bf16[16,128], index: 3, kind: output, shape index: {}]  }
   0x1   :  { %113 = vmatprep.subr.bf16.mxu0 %v124_v0  ;;  %v17_v1 = vld [vmem:[%s162_s0] sm:$0xf]  ;;  %115 = vmatprep.mubr.msk.bf16.mxu0 %vm125_vm1, %v124_v0  ;;  %v126_v5 = vmov 0   ;;  %v19_v6 = vld [vmem:[%s164_s2 + $0x8] sm:$0xff] }
   0x2   :  { %v41_v2 = vsel %vm39_vm0, %v17_v1, 0  ;;  %v123_v3 = vld [vmem:[%s163_s1] sm:$0xff]   ;;  %122 = vset.pattern.permute.xlu0 %v126_v5 }
   0x3   :  { %v18_v4 = vld [vmem:[%s164_s2] sm:$0xff]  ;;  %114 = vmatpush3.bf16.msra.mxu0 %v41_v2 }
   0x4   :  { %22 = vperm.xlu0 %122, %v18_v4  }
   0x6   :  { %116 = vmatmul.mubr.msk.bf16.vlgmr.msra.gmra.mxu0 %vm35_vm2, %v123_v3 }
   0x8   :  { %27 = vperm.xlu0 %122, %v19_v6  }
  0x7f   :  { %v23_v7 = vpop.permute.xlu0 %22 }
  0x83   :  { %v28_v11 = vpop.permute.xlu0 %27 }
  0xc6   :  { %v77_v8 = vpop.f32.mrf.mxu0 }
  0xc7   :  { %v78_v10 = vadd.f32 %v77_v8, %v23_v7 }
  0xc8   :  { %v117_v9 = vpop.f32.mrf.mxu0 }
  0xc9   :  { %v84_v15 = vmax.f32 %v78_v10, 0.0 }
  0xca   :  { %v80_v12 = vpop.f32.mrf.mxu0 }
  0xcb   :  { %v81_v13 = vadd.f32 %v80_v12, %v28_v11 }
  0xcc   :  { %v118_v14 = vpop.f32.mrf.mxu0 }
  0xcd   :  { %v85_v16 = vmax.f32 %v81_v13, 0.0 }
  0xcf   :  { %v109_v17 = vpack.c.bf16 %v85_v16, %v84_v15 }
  0xd1   :  { %110 = vst [vmem:[%s165_s3] sm:$0xff] %v109_v17  }

// kernel: up_forward.4
= control target key start
LH: loop header
LB: loop body
LE: loop exit
PB: predicated region body
PF: predicated region fallthrough
CT: control target
= control target key end

     0   :  { %s1023_s18 = smov 0   ;;  %s1223_s0 = inlined_call_operand.vmem [shape: bf16[2,4,512], index: 0, kind: input, shape index: {}]   ;;  %s1224_s1 = inlined_call_operand.vmem [shape: bf16[2,4,512], index: 1, kind: input, shape index: {}]   ;;  %s1225_s2 = inlined_call_operand.vmem [shape: bf16[3,4,24], index: 2, kind: input, shape index: {}]   ;;  %s1226_s3 = inlined_call_operand.vmem [shape: f32[4,1], index: 3, kind: input, shape index: {}]   ;;  %s1227_s4 = inlined_call_operand.vmem [shape: f32[1,288], index: 4, kind: input, shape index: {}]   ;;  %s1228_s5 = inlined_call_operand.vmem [shape: bf16[2,4,512], index: 5, kind: output, shape index: {}]  }
   0x1 LB: > { %s893_s19 = sadd.s32 4294967295, %s982_s18   ;;  %p897_p0 = scmp.ge.s32.totalorder %s982_s18, 1  ;;  %s982_s18 = sphi %s1023_s18, %s15_s18  }
   0x2   : > { %p197_p1 = scmp.lt.s32.totalorder %s982_s18, 3 }
   0x4   : > { %p198_p2 = pnand %p897_p0, %p197_p1 }
   0x5   : > { %p230_p3 = scmp.lt.s32.totalorder (!%p198_p2), %s893_s19, 1  ;;  %s985_s27 = smov (!%p198_p2), 127  }
   0x6   : > { %201 = sbr.rel (%p198_p2) target bundleno = 531 (0x213), region = 40  ;;  %s986_s28 = smov (!%p198_p2), 126  }
   0x7   : > { %s988_s29 = smov (!%p198_p2), 1   ;;  %s989_s30 = smov (!%p198_p2), 19  }
   0x8   : > { %s990_s6 = smov (!%p198_p2), 111  }
   0xb   : > { %v253_v0 = vlaneseq  ;;  %v984_v1 = vmov 1983009808   ;;  %s1230_s19 = smov (!%p230_p3, %s893_s19), 1  ;;  %v987_v30 = vmov 0.0   ;;  %vm352_vm0 = vcmask 1041408  }
   0xc   : > { %v251_v2 = vunpack.c.l.s4 %v984_v1  ;;  %s1033_s20 = sshll.u32 %s1230_s19, 3  ;;  %930 = vmatprep.subr.bf16.mxu1 %v987_v30  ;;  %vm283_vm1 = vcmask 1039360   ;;  %vm297_vm2 = vcmask 1031168   ;;  %vm365_vm3 = vcmask 1043456  }
   0xd   : > { %v1031_v3 = vshrl.u32 %v253_v0, 7  ;;  %s239_s23 = scalar_lea.vmem %s1224_s1, %s1033_s20  ;;  %s234_s26 = scalar_lea.vmem %s1223_s0, %s1033_s20  ;;  %vm374_vm4 = vcmask 1045504   ;;  %vm991_vm5 = vmmov 0   ;;  %vm422_vm6 = vcmask 7168  }
   0xe   : > { %v252_v4 = vunpack.c.0.s8 %v251_v2  ;;  %v247_v6 = vld [vmem:[%s239_s23] sm:$0xff]  ;;  %s1113_s9 = scalar_lea.vmem %s1228_s5, %s1033_s20  ;;  %934 = vmatprep.mubr.msk.bf16.mxu1 %vm991_vm5, %v987_v30  ;;  %v992_v2 = vmov 0   ;;  %vm542_vm7 = vcmask 154624   ;;  %vm432_vm8 = vcmask 195584  }
   0xf   : > { %v319_v8 = vcombine.high %v247_v6, %v247_v6  ;;  %v302_v11 = vcombine.low %v247_v6, %v247_v6  ;;  %v246_v12 = vld [vmem:[%s234_s26] sm:$0xff]  ;;  %477 = vmatprep.mubr.bf16.mxu0 %v992_v2  ;;  %795 = vst [vmem:[%s1113_s9] sm:$0x3] %v992_v2  ;;  %971 = vset.pattern.permute.xlu0 %v992_v2  ;;  %vm659_vm9 = vcmask 908288   ;;  %vm819_vm10 = vcmask 1043458  }
  0x10   : > { %v1040_v5 = vsub.s32 %v252_v4, %v1031_v3  ;;  %v266_v14 = vcombine.low %v246_v12, %v246_v12  ;;  %v249_v20 = vcombine.high %v246_v12, %v246_v12  ;;  %vm820_vm11 = vmor %vm819_vm10, %vm352_vm0  ;;  %vm821_vm12 = vcmask 259076  }
  0x11   : > { %vm822_vm13 = vmor %vm821_vm12, %vm820_vm11  ;;  %vm824_vm14 = vcmask 1041664  }
  0x12   : > { %v1043_v7 = vrot.slane %v247_v6, %v1040_v5  ;;  %v326_v9 = vrot.slane %v319_v8, %v1040_v5  ;;  %v1054_v13 = vrot.slane %v302_v11, %v1040_v5  ;;  %v273_v16 = vrot.slane %v266_v14, %v1040_v5 }
  0x13   : > { %v1062_v19 = vrot.slane %v246_v12, %v1040_v5  ;;  %v1068_v22 = vrot.slane %v249_v20, %v1040_v5 }
  0x14   : > { %329 = vrot.lane.b32.xlu0 %v1043_v7, %s985_s27  ;;  %v327_v10 = vcombine.high %v1043_v7, %v1043_v7  ;;  %333 = vrot.lane.b32.xlu1 %v326_v9, %s985_s27  ;;  %v328_v15 = vcombine.high %v326_v9, %v326_v9  ;;  %v340_v17 = vcombine.high %v1054_v13, %v1054_v13 }
  0x15   : > { %v274_v18 = vcombine.high %v273_v16, %v273_v16  ;;  %v264_v21 = vcombine.high %v1062_v19, %v1062_v19  ;;  %v288_v23 = vcombine.low %v1068_v22, %v1068_v22  ;;  %v287_v24 = vcombine.low %v1062_v19, %v1062_v19 }
  0x16   : > { %v265_v45 = vcombine.high %v1068_v22, %v1068_v22  ;;  %v317_v0 = vcombine.low %v1054_v13, %v1054_v13 }
  0x18   : > { %331 = vrot.lane.b32.xlu0 %v327_v10, %s985_s27  ;;  %347 = vrot.lane.b32.xlu1 %v327_v10, %s986_s28  ;;  %v318_v10 = vcombine.low %v1043_v7, %v1043_v7 }
  0x1c   : > { %341 = vrot.lane.b32.xlu0 %v1054_v13, %s986_s28  ;;  %335 = vrot.lane.b32.xlu1 %v328_v15, %s985_s27 }
  0x20   : > { %345 = vrot.lane.b32.xlu0 %v1043_v7, %s986_s28  ;;  %343 = vrot.lane.b32.xlu1 %v340_v17, %s986_s28 }
  0x24   : > { %277 = vrot.lane.b32.xlu0 %v274_v18, %s985_s27  ;;  %279 = vrot.lane.b32.xlu1 %v1062_v19, %s985_s27 }
  0x28   : > { %281 = vrot.lane.b32.xlu0 %v264_v21, %s985_s27  ;;  %275 = vrot.lane.b32.xlu1 %v273_v16, %s985_s27 }
  0x2c   : > { %291 = vrot.lane.b32.xlu0 %v1062_v19, %s986_s28  ;;  %293 = vrot.lane.b32.xlu1 %v288_v23, %s986_s28 }
  0x30   : > { %295 = vrot.lane.b32.xlu0 %v1068_v22, %s986_s28  ;;  %289 = vrot.lane.b32.xlu1 %v287_v24, %s986_s28 }
  0x86   : > { %v330_v25 = vpop.permute.xlu0 %329  ;;  %v334_v26 = vpop.permute.xlu1 %333 }
  0x8a   : > { %v332_v27 = vpop.permute.xlu0 %331  ;;  %v348_v28 = vpop.permute.xlu1 %347 }
  0x8b   : > { %v337_v35 = vsel %vm283_vm1, %v330_v25, %v332_v27  ;;  %v338_v55 = vsel %vm283_vm1, %v332_v27, %v334_v26 }
  0x8e   : > { %v342_v29 = vpop.permute.xlu0 %341  ;;  %v336_v31 = vpop.permute.xlu1 %335 }
  0x8f   : > { %v1078_v32 = vsel %vm352_vm0, %v336_v31, %v348_v28  ;;  %v339_v39 = vsel %vm283_vm1, %v334_v26, %v336_v31 }
  0x90   : > { %420 = vrot.lane.b32.xlu1 %v1078_v32, %s988_s29 }
  0x92   : > { %v346_v33 = vpop.permute.xlu0 %345  ;;  %v344_v34 = vpop.permute.xlu1 %343 }
  0x93   : > { %v349_v36 = vsel %vm297_vm2, %v342_v29, %v344_v34  ;;  %v351_v40 = vsel %vm297_vm2, %v346_v33, %v348_v28  ;;  %v350_v50 = vsel %vm297_vm2, %v344_v34, %v346_v33 }
  0x94   : > { %v385_v38 = vsel %vm352_vm0, %v337_v35, %v349_v36  ;;  %v391_v43 = vsel %vm352_vm0, %v339_v39, %v351_v40  ;;  %v388_v58 = vsel %vm352_vm0, %v338_v55, %v350_v50 }
  0x95   : > { %414 = vrot.lane.b32.xlu0 %v385_v38, %s988_s29 }
  0x96   : > { %v278_v37 = vpop.permute.xlu0 %277  ;;  %v280_v41 = vpop.permute.xlu1 %279 }
  0x97   : > { %v285_v51 = vsel %vm283_vm1, %v278_v37, %v280_v41 }
  0x98   : > { %v358_v57 = vsel %vm352_vm0, %v264_v21, %v285_v51 }
  0x99   : > { %418 = vrot.lane.b32.xlu0 %v391_v43, %s988_s29 }
  0x9a   : > { %v282_v42 = vpop.permute.xlu0 %281  ;;  %v276_v44 = vpop.permute.xlu1 %275 }
  0x9b   : > { %v364_v48 = vsel %vm352_vm0, %v265_v45, %v282_v42  ;;  %v284_v59 = vsel %vm283_vm1, %v276_v44, %v278_v37  ;;  %v286_v4 = vsel %vm283_vm1, %v280_v41, %v282_v42  ;;  %v904_v37 = vld [vmem:[%s1225_s2 + $0x2] sm:$0x3] }
  0x9c   : > { %v355_v62 = vsel %vm352_vm0, %v1062_v19, %v284_v59  ;;  %v361_v9 = vsel %vm352_vm0, %v1068_v22, %v286_v4 }
  0x9d   : > { %534 = vrot.lane.b32.xlu0 %v385_v38, %s989_s30 }
  0x9e   : > { %v292_v46 = vpop.permute.xlu0 %291  ;;  %v294_v47 = vpop.permute.xlu1 %293 }
  0x9f   : > { %v299_v53 = vsel %vm297_vm2, %v292_v46, %v294_v47 }
  0xa0   : > { %v369_v60 = vsel %vm365_vm3, %v358_v57, %v299_v53 }
  0xa1   : > { %538 = vrot.lane.b32.xlu0 %v391_v43, %s989_s30  ;;  %v378_v63 = vsel %vm374_vm4, %v369_v60, %v1054_v13 }
  0xa2   : > { %v296_v49 = vpop.permute.xlu0 %295  ;;  %v290_v56 = vpop.permute.xlu1 %289 }
  0xa3   : > { %v373_v52 = vsel %vm365_vm3, %v364_v48, %v296_v49  ;;  %v298_v61 = vsel %vm297_vm2, %v290_v56, %v292_v46  ;;  %v300_v6 = vsel %vm297_vm2, %v294_v47, %v296_v49  ;;  %v395_v49 = vld [vmem:[%s1225_s2] sm:$0x3] }
  0xa4   : > { %v382_v54 = vsel %vm374_vm4, %v373_v52, %v1043_v7  ;;  %v367_v1 = vsel %vm365_vm3, %v355_v62, %v298_v61  ;;  %v371_v11 = vsel %vm365_vm3, %v361_v9, %v300_v6  ;;  %v763_v7 = vld [vmem:[%s1226_s3] sm:$0xf] }
  0xa5   : > { %412 = vrot.lane.b32.xlu1 %v382_v54, %s988_s29  ;;  %653 = vrot.lane.b32.xlu0 %v388_v58, %s990_s6  ;;  %v376_v8 = vsel %vm374_vm4, %v367_v1, %v317_v0  ;;  %v380_v12 = vsel %vm374_vm4, %v371_v11, %v318_v10 }
  0xa9   : > { %540 = vrot.lane.b32.xlu1 %v1078_v32, %s989_s30  ;;  %408 = vrot.lane.b32.xlu0 %v378_v63, %s988_s29 }
  0xad   : > { %416 = vrot.lane.b32.xlu1 %v388_v58, %s988_s29  ;;  %406 = vrot.lane.b32.xlu0 %v376_v8, %s988_s29 }
  0xb1   : > { %536 = vrot.lane.b32.xlu1 %v388_v58, %s989_s30  ;;  %528 = vrot.lane.b32.xlu0 %v378_v63, %s989_s30  ;;  %v911_v58 = vld [vmem:[%s1225_s2 + $0x4] sm:$0x3] }
  0xb5   : > { %410 = vrot.lane.b32.xlu1 %v380_v12, %s988_s29  ;;  %526 = vrot.lane.b32.xlu0 %v376_v8, %s989_s30 }
  0xb9   : > { %532 = vrot.lane.b32.xlu1 %v382_v54, %s989_s30  ;;  %657 = vrot.lane.b32.xlu0 %v1078_v32, %s990_s6 }
  0xbd   : > { %530 = vrot.lane.b32.xlu1 %v380_v12, %s989_s30  ;;  %651 = vrot.lane.b32.xlu0 %v382_v54, %s990_s6 }
  0xc1   : > { %655 = vrot.lane.b32.xlu1 %v391_v43, %s990_s6  ;;  %766 = vperm.xlu0 %971, %v763_v7  }
  0xc5   : > { %649 = vrot.lane.b32.xlu1 %v380_v12, %s990_s6 }
  0xc9   : > { %647 = vrot.lane.b32.xlu1 %v378_v63, %s990_s6 }
 0x102   : > { %v421_v14 = vpop.permute.xlu1 %420 }
 0x107   : > { %v415_v13 = vpop.permute.xlu0 %414 }
 0x10b   : > { %v419_v15 = vpop.permute.xlu0 %418 }
 0x10c   : > { %v428_v16 = vsel %vm422_vm6, %v419_v15, %v421_v14 }
 0x10d   : > { %v443_v17 = vsel %vm365_vm3, %v428_v16, 0 }
 0x10e   : > { %931 = vmatpush3.bf16.msra.mxu1 %v443_v17  ;;  %v787_v17 = vsub.s32 2, %v1031_v3 }
 0x10f   : > { %v535_v18 = vpop.permute.xlu0 %534  ;;  %932 = vmatprep.subr.bf16.mxu1 %v987_v30 }
 0x113   : > { %v539_v19 = vpop.permute.xlu0 %538 }
 0x117   : > { %v413_v20 = vpop.permute.xlu1 %412  ;;  %v654_v21 = vpop.permute.xlu0 %653 }
 0x11b   : > { %v541_v22 = vpop.permute.xlu1 %540  ;;  %v409_v23 = vpop.permute.xlu0 %408 }
 0x11c   : > { %v548_v35 = vsel %vm542_vm7, %v539_v19, %v541_v22 }
 0x11d   : > { %v562_v42 = vsel %vm365_vm3, %v548_v35, 0 }
 0x11f   : > { %v417_v24 = vpop.permute.xlu1 %416  ;;  %v407_v27 = vpop.permute.xlu0 %406 }
 0x120   : > { %v427_v25 = vsel %vm422_vm6, %v417_v24, %v419_v15  ;;  %v426_v26 = vsel %vm422_vm6, %v415_v13, %v417_v24  ;;  %v423_v36 = vsel %vm422_vm6, %v407_v27, %v409_v23 }
 0x121   : > { %905 = vmatprep.subr.msk.bf16.mxu0 %vm365_vm3, %v427_v25  ;;  %v437_v28 = vsel %vm365_vm3, %v426_v26, 0  ;;  %v779_v25 = vsub.s32 0, %v1031_v3 }
 0x122   : > { %458 = vmatpush1.bf16.msra.mxu0 %v437_v28 }
 0x123   : > { %v537_v29 = vpop.permute.xlu1 %536  ;;  %v529_v31 = vpop.permute.xlu0 %528 }
 0x124   : > { %v546_v38 = vsel %vm542_vm7, %v535_v18, %v537_v29  ;;  %v547_v39 = vsel %vm542_vm7, %v537_v29, %v539_v19 }
 0x125   : > { %v556_v43 = vsel %vm365_vm3, %v546_v38, 0 }
 0x127   : > { %v411_v32 = vpop.permute.xlu1 %410  ;;  %v527_v40 = vpop.permute.xlu0 %526 }
 0x128   : > { %v424_v33 = vsel %vm422_vm6, %v409_v23, %v411_v32  ;;  %v425_v34 = vsel %vm422_vm6, %v411_v32, %v413_v20  ;;  %v543_v47 = vsel %vm542_vm7, %v527_v40, %v529_v31  ;;  %v775_v20 = vld [vmem:[%s1227_s4] sm:$0x7] }
 0x129   : > { %459 = vmatprep.subr.bf16.mxu0 %v424_v33  ;;  %933 = vmatpush3.bf16.msra.mxu1 %v425_v34  ;;  %v788_v27 = vrot.slane %v775_v20, %v787_v17 }
 0x12a   : > { %460 = vmatpush1.bf16.msra.mxu0 %v423_v36  ;;  %938 = vmatprep.subr.bf16.mxu1 %v987_v30 }
 0x12b   : > { %908 = vmatprep.subr.msk.bf16.mxu0 %vm365_vm3, %v547_v39  ;;  %v533_v41 = vpop.permute.xlu1 %532  ;;  %v658_v48 = vpop.permute.xlu0 %657 }
 0x12c   : > { %935 = vmatmul.mubr.msk.bf16.vlgmr.msra.gmra.mxu1 %vm432_vm8, %v904_v37  ;;  %v677_v53 = vsel %vm365_vm3, %v658_v48, 0 }
 0x12d   : > { %906 = vmatmul.mubr.msk.bf16.vlgmr.msra.gmra.mxu0 %vm432_vm8, %v904_v37  ;;  %939 = vmatpush3.bf16.msra.mxu1 %v562_v42  ;;  %v780_v37 = vrot.slane %v775_v20, %v779_v25 }
 0x12e   : > { %577 = vmatpush1.bf16.msra.mxu0 %v556_v43  ;;  %940 = vmatprep.subr.bf16.mxu1 %v987_v30 }
 0x12f   : > { %v531_v44 = vpop.permute.xlu1 %530  ;;  %942 = vmatprep.mubr.msk.bf16.mxu1 %vm991_vm5, %v987_v30  ;;  %596 = vmatprep.mubr.bf16.mxu0 %v992_v2  ;;  %v652_v55 = vpop.permute.xlu0 %651 }
 0x130   : > { %v545_v45 = vsel %vm542_vm7, %v531_v44, %v533_v41  ;;  %v544_v46 = vsel %vm542_vm7, %v529_v31, %v531_v44  ;;  %v783_v31 = vsub.s32 1, %v1031_v3 }
 0x131   : > { %578 = vmatprep.subr.bf16.mxu0 %v544_v46  ;;  %941 = vmatpush3.bf16.msra.mxu1 %v545_v45 }
 0x132   : > { %579 = vmatpush1.bf16.msra.mxu0 %v543_v47  ;;  %946 = vmatprep.subr.bf16.mxu1 %v987_v30  ;;  %v784_v42 = vrot.slane %v775_v20, %v783_v31 }
 0x133   : > { %v656_v50 = vpop.permute.xlu1 %655 }
 0x134   : > { %v662_v51 = vsel %vm659_vm9, %v654_v21, %v656_v50  ;;  %v663_v52 = vsel %vm659_vm9, %v656_v50, %v658_v48  ;;  %943 = vmatmul.mubr.msk.bf16.vlgmr.msra.gmra.mxu1 %vm432_vm8, %v395_v49 }
 0x135   : > { %v671_v54 = vsel %vm365_vm3, %v662_v51, 0  ;;  %909 = vmatmul.mubr.msk.bf16.vlgmr.msra.gmra.mxu0 %vm432_vm8, %v395_v49  ;;  %912 = vmatprep.subr.msk.bf16.mxu0 %vm365_vm3, %v663_v52 }
 0x136   : > { %947 = vmatpush3.bf16.msra.mxu1 %v677_v53  ;;  %692 = vmatpush1.bf16.msra.mxu0 %v671_v54 }
 0x137   : > { %v650_v56 = vpop.permute.xlu1 %649  ;;  %948 = vmatprep.subr.bf16.mxu1 %v987_v30  ;;  %950 = vmatprep.mubr.msk.bf16.mxu1 %vm991_vm5, %v987_v30 }
 0x138   : > { %v661_v57 = vsel %vm659_vm9, %v650_v56, %v652_v55  ;;  %711 = vmatprep.mubr.bf16.mxu0 %v992_v2 }
 0x139   : > { %693 = vmatprep.subr.bf16.mxu0 %v661_v57 }
 0x13a   : > { %949 = vmatpush3.bf16.msra.mxu1 %v652_v55 }
 0x13b   : > { %v648_v59 = vpop.permute.xlu1 %647 }
 0x13c   : > { %v660_v60 = vsel %vm659_vm9, %v648_v59, %v650_v56  ;;  %v767_v18 = vpop.permute.xlu0 %766 }
 0x13d   : > { %951 = vmatmul.mubr.msk.bf16.vlgmr.msra.gmra.mxu1 %vm432_vm8, %v911_v58  ;;  %694 = vmatpush1.bf16.msra.mxu0 %v660_v60 }
 0x140   : > { %913 = vmatmul.mubr.msk.bf16.vlgmr.msra.gmra.mxu0 %vm432_vm8, %v911_v58 }
 0x1ec   : > { %v520_v61 = vpop.f32.mrf.mxu1 }
 0x1ed   : > { %v479_v30 = vpop.f32.mrf.mxu0 }
 0x1ee   : > { %v936_v62 = vpop.f32.mrf.mxu1 }
 0x1ef   : > { %v481_v63 = vpop.f32.mrf.mxu0 }
 0x1f0   : > { %v523_v0 = vpop.f32.mrf.mxu1 }
 0x1f1   : > { %v483_v1 = vpop.f32.mrf.mxu0 }
 0x1f2   : > { %v937_v4 = vpop.f32.mrf.mxu1 }
 0x1f3   : > { %v484_v6 = vpop.f32.mrf.mxu0 }
 0x1f4   : > { %v639_v8 = vpop.f32.mrf.mxu1 }
 0x1f5   : > { %v598_v9 = vpop.f32.mrf.mxu0  ;;  %v640_v15 = vadd.f32 %v639_v8, %v520_v61 }
 0x1f6   : > { %v944_v10 = vpop.f32.mrf.mxu1  ;;  %v599_v21 = vadd.f32 %v598_v9, %v479_v30 }
 0x1f7   : > { %v600_v11 = vpop.f32.mrf.mxu0 }
 0x1f8   : > { %v642_v12 = vpop.f32.mrf.mxu1  ;;  %v601_v26 = vadd.f32 %v600_v11, %v481_v63 }
 0x1f9   : > { %v602_v7 = vpop.f32.mrf.mxu0 }
 0x1fa   : > { %v945_v13 = vpop.f32.mrf.mxu1 }
 0x1fb   : > { %v603_v14 = vpop.f32.mrf.mxu0 }
 0x1fd   : > { %v754_v16 = vpop.f32.mrf.mxu1 }
 0x1fe   : > { %v762_v19 = vadd.f32 %v754_v16, %v640_v15 }
 0x1ff   : > { %v952_v22 = vpop.f32.mrf.mxu1 }
 0x200   : > { %v771_v23 = vadd.f32 %v767_v18, %v762_v19  ;;  %v713_v24 = vpop.f32.mrf.mxu0 }
 0x201   : > { %v760_v28 = vadd.f32 %v713_v24, %v599_v21  ;;  %v757_v29 = vpop.f32.mrf.mxu1 }
 0x202   : > { %v774_v32 = vmax.f32 %v771_v23, 0.0  ;;  %v715_v33 = vpop.f32.mrf.mxu0 }
 0x203   : > { %v769_v34 = vadd.f32 %v767_v18, %v760_v28  ;;  %v761_v35 = vadd.f32 %v715_v33, %v601_v26  ;;  %v953_v36 = vpop.f32.mrf.mxu1 }
 0x204   : > { %v717_v38 = vpop.f32.mrf.mxu0  ;;  %v794_v39 = vmul.f32 %v788_v27, %v774_v32 }
 0x205   : > { %v772_v40 = vmax.f32 %v769_v34, 0.0  ;;  %v770_v41 = vadd.f32 %v767_v18, %v761_v35 }
 0x206   : > { %v718_v43 = vpop.f32.mrf.mxu0  ;;  %v798_v45 = vpack.c.bf16 %v794_v39, %v794_v39 }
 0x207   : > { %v773_v44 = vmax.f32 %v770_v41, 0.0  ;;  %v792_v46 = vmul.f32 %v780_v37, %v772_v40 }
 0x208   : > { %v816_v48 = vrot.slane %v798_v45, %v1040_v5 }
 0x209   : > { %v793_v47 = vmul.f32 %v784_v42, %v773_v44 }
 0x20b   : > { %v915_v3 = vpack.c.bf16 %v793_v47, %v792_v46 }
 0x20d   : > { %v809_v49 = vrot.slane %v915_v3, %v1040_v5 }
 0x20f   : > { %v817_v50 = vcombine.low %v809_v49, %v816_v48 }
 0x211   : > { %823 = vst.msk [vmem:[%s1113_s9 + $0x2] sm:$0x3f] %vm822_vm13, %v817_v50 }
 0x212   : > { %825 = vst.msk [vmem:[%s1113_s9 + $0x6] sm:$0x3] %vm824_vm14, %v992_v2 }
 0x213 PF: > { %s15_s18 = sadd.s32 1, %s982_s18  }
 0x214   : > { %p12_p4 = scmp.ge.s32.totalorder %s15_s18, 4  }
 0x216   :  { %14 = sbr.rel (!%p12_p4) target bundleno = 1 (0x1), region = 75 }

// kernel: up_forward.5
= control target key start
LH: loop header
LB: loop body
LE: loop exit
PB: predicated region body
PF: predicated region fallthrough
CT: control target
= control target key end

     0   :  { %s753_s12 = smov 0   ;;  %s825_s0 = inlined_call_operand.vmem [shape: bf16[2,4,512], index: 0, kind: input, shape index: {}]   ;;  %s826_s1 = inlined_call_operand.vmem [shape: bf16[3,4,12], index: 1, kind: input, shape index: {}]   ;;  %s827_s2 = inlined_call_operand.vmem [shape: f32[4,1], index: 2, kind: input, shape index: {}]   ;;  %s828_s3 = inlined_call_operand.vmem [shape: f32[2,4,288], index: 3, kind: output, shape index: {}]  }
   0x1 LB: > { %s648_s13 = sadd.s32 4294967295, %s722_s12   ;;  %p652_p0 = scmp.ge.s32.totalorder %s722_s12, 1  ;;  %s722_s12 = sphi %s753_s12, %s13_s12  }
   0x2   : > { %p137_p1 = scmp.lt.s32.totalorder %s722_s12, 3 }
   0x4   : > { %p138_p2 = pnand %p652_p0, %p137_p1 }
   0x5   : > { %p161_p3 = scmp.lt.s32.totalorder (!%p138_p2), %s648_s13, 1  ;;  %s725_s18 = smov (!%p138_p2), 127  }
   0x6   : > { %141 = sbr.rel (%p138_p2) target bundleno = 493 (0x1ed), region = 32  ;;  %s726_s19 = smov (!%p138_p2), 126  }
   0x7   : > { %s730_s20 = smov (!%p138_p2), 1   ;;  %s731_s21 = smov (!%p138_p2), 19  }
   0x8   : > { %s732_s22 = smov (!%p138_p2), 111  }
   0xb   : > { %v178_v0 = vlaneseq  ;;  %v724_v1 = vmov 1983009808   ;;  %s830_s13 = smov (!%p161_p3, %s648_s13), 1  ;;  %v727_v21 = vmov 0.0   ;;  %vm208_vm0 = vcmask 1039360  }
   0xc   : > { %v176_v2 = vunpack.c.l.s4 %v724_v1  ;;  %s669_s14 = sshll.u32 %s830_s13, 3  ;;  %676 = vmatprep.subr.bf16.mxu1 %v727_v21  ;;  %vm226_vm1 = vcmask 1041408   ;;  %v728_v25 = vmov 0   ;;  %vm729_vm2 = vmmov 0   ;;  %v574_v41 = vld [vmem:[%s827_s2] sm:$0xf] }
   0xd   : > { %v179_v3 = vshrl.u32 %v178_v0, 7  ;;  %s165_s17 = scalar_lea.vmem %s825_s0, %s669_s14  ;;  %313 = vmatprep.mubr.bf16.mxu0 %v728_v25  ;;  %712 = vset.pattern.permute.xlu1 %v728_v25  ;;  %vm222_vm3 = vcmask 1031168   ;;  %vm239_vm4 = vcmask 1043456   ;;  %vm263_vm5 = vcmask 7168   ;;  %v656_v51 = vld [vmem:[%s826_s1 + $0x2] sm:$0x3] }
   0xe   : > { %v177_v4 = vunpack.c.0.s8 %v176_v2  ;;  %v172_v6 = vld [vmem:[%s165_s17] sm:$0xff]  ;;  %678 = vmatprep.mubr.msk.bf16.mxu1 %vm729_vm2, %v727_v21  ;;  %713 = vset.pattern.permute.xlu0 %v728_v25  ;;  %vm271_vm6 = vcmask 1045504   ;;  %vm370_vm7 = vcmask 154624   ;;  %vm267_vm8 = vcmask 97280   ;;  %s694_s4 = smul.u32 12, %s830_s13 }
   0xf   : > { %v191_v8 = vcombine.low %v172_v6, %v172_v6  ;;  %v174_v11 = vcombine.high %v172_v6, %v172_v6  ;;  %v248_v61 = vld [vmem:[%s826_s1] sm:$0x3]  ;;  %vm475_vm9 = vcmask 908288   ;;  %vm591_vm10 = vcmask 257024  }
  0x10   : > { %v180_v5 = vsub.s32 %v177_v4, %v179_v3  ;;  %s170_s7 = scalar_lea.vmem %s828_s3, %s694_s4 }
  0x12   : > { %v181_v7 = vrot.slane %v172_v6, %v180_v5  ;;  %v198_v9 = vrot.slane %v191_v8, %v180_v5  ;;  %v188_v14 = vrot.slane %v174_v11, %v180_v5  ;;  %v663_v5 = vld [vmem:[%s826_s1 + $0x4] sm:$0x3] }
  0x14   : > { %204 = vrot.lane.b32.xlu1 %v181_v7, %s725_s18  ;;  %200 = vrot.lane.b32.xlu0 %v198_v9, %s725_s18  ;;  %v212_v10 = vcombine.low %v181_v7, %v181_v7  ;;  %v189_v12 = vcombine.high %v181_v7, %v181_v7  ;;  %v199_v13 = vcombine.high %v198_v9, %v198_v9 }
  0x15   : > { %v213_v15 = vcombine.low %v188_v14, %v188_v14  ;;  %v190_v26 = vcombine.high %v188_v14, %v188_v14 }
  0x18   : > { %216 = vrot.lane.b32.xlu1 %v181_v7, %s726_s19  ;;  %214 = vrot.lane.b32.xlu0 %v212_v10, %s726_s19 }
  0x1c   : > { %206 = vrot.lane.b32.xlu1 %v189_v12, %s725_s18  ;;  %202 = vrot.lane.b32.xlu0 %v199_v13, %s725_s18 }
  0x20   : > { %220 = vrot.lane.b32.xlu1 %v188_v14, %s726_s19  ;;  %218 = vrot.lane.b32.xlu0 %v213_v15, %s726_s19 }
  0x86   : > { %v205_v16 = vpop.permute.xlu1 %204  ;;  %v201_v17 = vpop.permute.xlu0 %200 }
  0x8a   : > { %v217_v18 = vpop.permute.xlu1 %216  ;;  %v215_v19 = vpop.permute.xlu0 %214 }
  0x8b   : > { %v223_v38 = vsel %vm222_vm3, %v215_v19, %v217_v18 }
  0x8e   : > { %v207_v20 = vpop.permute.xlu1 %206  ;;  %v203_v22 = vpop.permute.xlu0 %202 }
  0x8f   : > { %v211_v23 = vsel %vm208_vm0, %v205_v16, %v207_v20  ;;  %v210_v24 = vsel %vm208_vm0, %v203_v22, %v205_v16  ;;  %v209_v27 = vsel %vm208_vm0, %v201_v17, %v203_v22  ;;  %v238_v36 = vsel %vm226_vm1, %v190_v26, %v207_v20 }
  0x90   : > { %v235_v32 = vsel %vm226_vm1, %v188_v14, %v211_v23  ;;  %v232_v33 = vsel %vm226_vm1, %v189_v12, %v210_v24  ;;  %v229_v37 = vsel %vm226_vm1, %v181_v7, %v209_v27 }
  0x91   : > { %v241_v39 = vsel %vm239_vm4, %v229_v37, %v223_v38 }
  0x92   : > { %v221_v28 = vpop.permute.xlu1 %220  ;;  %v219_v29 = vpop.permute.xlu0 %218 }
  0x93   : > { %v224_v30 = vsel %vm222_vm3, %v217_v18, %v219_v29  ;;  %v225_v31 = vsel %vm222_vm3, %v219_v29, %v221_v28  ;;  %v247_v40 = vsel %vm239_vm4, %v238_v36, %v221_v28 }
  0x94   : > { %v245_v34 = vsel %vm239_vm4, %v235_v32, %v225_v31  ;;  %v243_v35 = vsel %vm239_vm4, %v232_v33, %v224_v30 }
  0x95   : > { %259 = vrot.lane.b32.xlu0 %v245_v34, %s730_s20  ;;  %257 = vrot.lane.b32.xlu1 %v243_v35, %s730_s20 }
  0x99   : > { %255 = vrot.lane.b32.xlu0 %v241_v39, %s730_s20  ;;  %261 = vrot.lane.b32.xlu1 %v247_v40, %s730_s20 }
  0x9d   : > { %366 = vrot.lane.b32.xlu0 %v245_v34, %s731_s21  ;;  %364 = vrot.lane.b32.xlu1 %v243_v35, %s731_s21 }
  0xa1   : > { %362 = vrot.lane.b32.xlu0 %v241_v39, %s731_s21  ;;  %368 = vrot.lane.b32.xlu1 %v247_v40, %s731_s21 }
  0xa5   : > { %469 = vrot.lane.b32.xlu0 %v243_v35, %s732_s22  ;;  %471 = vrot.lane.b32.xlu1 %v245_v34, %s732_s22 }
  0xa9   : > { %473 = vrot.lane.b32.xlu0 %v247_v40, %s732_s22  ;;  %577 = vperm.xlu1 %712, %v574_v41  }
 0x107   : > { %v260_v42 = vpop.permute.xlu0 %259  ;;  %v258_v43 = vpop.permute.xlu1 %257 }
 0x108   : > { %v265_v44 = vsel %vm263_vm5, %v258_v43, %v260_v42 }
 0x109   : > { %657 = vmatprep.subr.msk.bf16.mxu0 %vm271_vm6, %v265_v44 }
 0x10b   : > { %v256_v45 = vpop.permute.xlu0 %255  ;;  %v262_v46 = vpop.permute.xlu1 %261 }
 0x10c   : > { %v264_v47 = vsel %vm263_vm5, %v256_v45, %v258_v43  ;;  %v266_v48 = vsel %vm263_vm5, %v260_v42, %v262_v46 }
 0x10d   : > { %v273_v49 = vsel %vm271_vm6, %v264_v47, 0  ;;  %v279_v50 = vsel %vm271_vm6, %v266_v48, 0 }
 0x10e   : > { %296 = vmatpush1.bf16.msra.mxu0 %v273_v49  ;;  %677 = vmatpush3.bf16.msra.mxu1 %v279_v50 }
 0x10f   : > { %v367_v52 = vpop.permute.xlu0 %366  ;;  %v365_v53 = vpop.permute.xlu1 %364  ;;  %682 = vmatprep.subr.bf16.mxu1 %v727_v21 }
 0x110   : > { %v372_v54 = vsel %vm370_vm7, %v365_v53, %v367_v52 }
 0x111   : > { %658 = vmatmul.mubr.msk.bf16.vlgmr.msra.gmra.mxu0 %vm267_vm8, %v656_v51  ;;  %679 = vmatmul.mubr.msk.bf16.vlgmr.msra.gmra.mxu1 %vm267_vm8, %v656_v51 }
 0x112   : > { %660 = vmatprep.subr.msk.bf16.mxu0 %vm271_vm6, %v372_v54  ;;  %418 = vmatprep.mubr.bf16.mxu0 %v728_v25 }
 0x113   : > { %v363_v55 = vpop.permute.xlu0 %362  ;;  %v369_v56 = vpop.permute.xlu1 %368  ;;  %684 = vmatprep.mubr.msk.bf16.mxu1 %vm729_vm2, %v727_v21 }
 0x114   : > { %v371_v57 = vsel %vm370_vm7, %v363_v55, %v365_v53  ;;  %v373_v58 = vsel %vm370_vm7, %v367_v52, %v369_v56 }
 0x115   : > { %v378_v59 = vsel %vm271_vm6, %v371_v57, 0  ;;  %v384_v60 = vsel %vm271_vm6, %v373_v58, 0 }
 0x116   : > { %401 = vmatpush1.bf16.msra.mxu0 %v378_v59  ;;  %683 = vmatpush3.bf16.msra.mxu1 %v384_v60 }
 0x117   : > { %v470_v62 = vpop.permute.xlu0 %469  ;;  %v472_v63 = vpop.permute.xlu1 %471  ;;  %688 = vmatprep.subr.bf16.mxu1 %v727_v21 }
 0x118   : > { %v476_v0 = vsel %vm475_vm9, %v470_v62, %v472_v63 }
 0x119   : > { %661 = vmatmul.mubr.msk.bf16.vlgmr.msra.gmra.mxu0 %vm267_vm8, %v248_v61  ;;  %685 = vmatmul.mubr.msk.bf16.vlgmr.msra.gmra.mxu1 %vm267_vm8, %v248_v61  ;;  %v482_v4 = vsel %vm271_vm6, %v476_v0, 0 }
 0x11a   : > { %522 = vmatprep.mubr.bf16.mxu0 %v728_v25  ;;  %690 = vmatprep.mubr.msk.bf16.mxu1 %vm729_vm2, %v727_v21 }
 0x11b   : > { %v474_v1 = vpop.permute.xlu0 %473 }
 0x11c   : > { %v477_v2 = vsel %vm475_vm9, %v472_v63, %v474_v1  ;;  %v488_v3 = vsel %vm271_vm6, %v474_v1, 0 }
 0x11d   : > { %664 = vmatprep.subr.msk.bf16.mxu0 %vm271_vm6, %v477_v2  ;;  %689 = vmatpush3.bf16.msra.mxu1 %v488_v3 }
 0x11e   : > { %505 = vmatpush1.bf16.msra.mxu0 %v482_v4 }
 0x121   : > { %665 = vmatmul.mubr.msk.bf16.vlgmr.msra.gmra.mxu0 %vm267_vm8, %v663_v5  ;;  %691 = vmatmul.mubr.msk.bf16.vlgmr.msra.gmra.mxu1 %vm267_vm8, %v663_v5 }
 0x124   : > { %v578_v24 = vpop.permute.xlu1 %577 }
 0x1d1   : > { %v315_v6 = vpop.f32.mrf.mxu0  ;;  %v356_v7 = vpop.f32.mrf.mxu1 }
 0x1d3   : > { %v317_v8 = vpop.f32.mrf.mxu0  ;;  %v680_v9 = vpop.f32.mrf.mxu1 }
 0x1d5   : > { %v319_v10 = vpop.f32.mrf.mxu0  ;;  %v359_v11 = vpop.f32.mrf.mxu1 }
 0x1d7   : > { %v320_v12 = vpop.f32.mrf.mxu0  ;;  %v681_v13 = vpop.f32.mrf.mxu1 }
 0x1d9   : > { %v420_v14 = vpop.f32.mrf.mxu0  ;;  %v461_v15 = vpop.f32.mrf.mxu1 }
 0x1da   : > { %v421_v22 = vadd.f32 %v420_v14, %v315_v6  ;;  %v462_v23 = vadd.f32 %v461_v15, %v356_v7 }
 0x1db   : > { %v422_v16 = vpop.f32.mrf.mxu0  ;;  %v686_v17 = vpop.f32.mrf.mxu1 }
 0x1dc   : > { %v423_v27 = vadd.f32 %v422_v16, %v317_v8 }
 0x1dd   : > { %v424_v18 = vpop.f32.mrf.mxu0  ;;  %v464_v19 = vpop.f32.mrf.mxu1 }
 0x1df   : > { %v425_v20 = vpop.f32.mrf.mxu0  ;;  %v687_v21 = vpop.f32.mrf.mxu1 }
 0x1e1   : > { %v524_v25 = vpop.f32.mrf.mxu0  ;;  %v565_v26 = vpop.f32.mrf.mxu1 }
 0x1e2   : > { %v571_v28 = vadd.f32 %v524_v25, %v421_v22  ;;  %v573_v29 = vadd.f32 %v565_v26, %v462_v23 }
 0x1e3   : > { %v526_v30 = vpop.f32.mrf.mxu0  ;;  %v692_v31 = vpop.f32.mrf.mxu1 }
 0x1e4   : > { %v572_v32 = vadd.f32 %v526_v30, %v423_v27  ;;  %v580_v33 = vadd.f32 %v578_v24, %v571_v28  ;;  %v582_v34 = vadd.f32 %v578_v24, %v573_v29 }
 0x1e5   : > { %v528_v35 = vpop.f32.mrf.mxu0  ;;  %v568_v36 = vpop.f32.mrf.mxu1 }
 0x1e6   : > { %v581_v37 = vadd.f32 %v578_v24, %v572_v32  ;;  %v585_v38 = vmax.f32 %v582_v34, 0.0  ;;  %v583_v41 = vmax.f32 %v580_v33, 0.0 }
 0x1e7   : > { %v529_v39 = vpop.f32.mrf.mxu0  ;;  %v693_v40 = vpop.f32.mrf.mxu1 }
 0x1e8   : > { %v584_v42 = vmax.f32 %v581_v37, 0.0  ;;  %592 = vst.msk [vmem:[%s170_s7 + $0x8] sm:$0xf] %vm591_vm10, %v585_v38 }
 0x1ea   : > { %v588_v43 = vcombine.low %v583_v41, %v584_v42 }
 0x1ec   : > { %590 = vst [vmem:[%s170_s7] sm:$0xff] %v588_v43 }
 0x1ed PF: > { %s13_s12 = sadd.s32 1, %s722_s12  }
 0x1ee   : > { %p10_p4 = scmp.ge.s32.totalorder %s13_s12, 4  }
 0x1f0   :  { %12 = sbr.rel (!%p10_p4) target bundleno = 1 (0x1), region = 64 }

</bundles_post_ra>
